<compile_context>
chip_gen: v5e
topology: v5e:2x2
jax: 0.10.0
libtpu: 0.0.40
codegen_flags: <defaults>
</compile_context>

<pallas_src>
import functools

import jax
import jax.numpy as jnp
from jax.experimental import pallas as pl
from jax.experimental.pallas import tpu as pltpu


def _round_up(n, m):
    return ((n + m - 1) // m) * m


def qnetwork_kernel(x_ref, w1_ref, b1_ref, w2_ref, b2_ref, w3_ref, b3_ref,
                    out_ref):
    """One batch tile, transposed (lane-dense) layout.

    x_ref : (S,  TB)   activations, batch in the lane dimension
    w*_ref: (out, in)  PyTorch-native nn.Linear weight layout
    b*_ref: (out, 1)   column biases (broadcast over lanes)
    out   : (A,  TB)
    """
    x = x_ref[...]

    # fc1 + ReLU                                  h1: (H0, TB)
    h1 = jnp.dot(w1_ref[...], x.astype(w1_ref.dtype),
                 preferred_element_type=jnp.float32) + b1_ref[...]
    h1 = jnp.maximum(h1, 0.0)

    # fc2 + ReLU                                  h2: (H1, TB)
    h2 = jnp.dot(w2_ref[...], h1.astype(w2_ref.dtype),
                 preferred_element_type=jnp.float32) + b2_ref[...]
    h2 = jnp.maximum(h2, 0.0)

    # fc3 (no activation)                         q : (A, TB)
    q = jnp.dot(w3_ref[...], h2.astype(w3_ref.dtype),
                preferred_element_type=jnp.float32) + b3_ref[...]
    out_ref[...] = q.astype(out_ref.dtype)


def _choose_tiling(B, batch_tile, S, H0, H1, A):
    """Pick (padded batch Bp, lane tile TB).

    Keeps live VMEM ~<12 MiB (safe under v5e's 16 MiB scoped default), uses a
    single full-batch tile when possible (lane dim == full array dim is always
    legal), otherwise pads only to a multiple of 128 lanes and picks a tile
    that divides the padded batch exactly.
    """
    budget = 12 * 1024 * 1024
    # double-buffered x/out tiles + f32 h1/h2 intermediates, per batch column
    per_col = 4 * (2 * S + 2 * A + H0 + H1)
    max_tile = max(8, min(batch_tile, budget // per_col))

    if B <= max_tile:
        return B, B                      # single grid step, no padding at all

    tile_cap = max(128, (max_tile // 128) * 128)
    Bp = _round_up(B, 128)               # lane alignment only (<=127 junk cols)
    n = Bp // 128
    best = 1
    d = 1
    while d * d <= n:                    # largest divisor of n with tile<=cap
        if n % d == 0:
            for c in (d, n // d):
                if c * 128 <= tile_cap and c > best:
                    best = c
        d += 1
    TB = best * 128
    if TB * 8 < tile_cap:                # pathological (e.g. prime) tile count:
        TB = tile_cap                    # fall back to padding one extra tile
        Bp = _round_up(B, TB)
    return Bp, TB


def reference_forward(x, p):
    """Plain-JAX reference matching the PyTorch QNetwork semantics.
    Weights are in PyTorch-native (out_features, in_features) layout."""
    h1 = jax.nn.relu(x @ p["w1"].T + p["b1"])
    h2 = jax.nn.relu(h1 @ p["w2"].T + p["b2"])
    return h2 @ p["w3"].T + p["b3"]


@functools.partial(
    jax.jit,
    static_argnames=("batch_tile", "min_pallas_batch", "compute_dtype",
                     "core_parallel"))
def qnetwork_forward(x, params, *, batch_tile=8192, min_pallas_batch=256,
                     compute_dtype=jnp.float32, core_parallel=False):
    """x: (B, state_size) float32. params: PyTorch-layout w1,b1,w2,b2,w3,b3."""
    B, S = x.shape
    H0 = params["w1"].shape[0]
    H1 = params["w2"].shape[0]
    A = params["w3"].shape[0]

    # Small-batch fast path: at RL-inference batch sizes the pallas_call is
    # pure launch/DMA-setup overhead; let XLA fuse the tiny MLP instead.
    if B < min_pallas_batch:
        return reference_forward(x, params)

    # MXU operands may be bf16 (v6e/v7x); bias-add / ReLU stay f32 (v5e VPU).
    w1 = params["w1"].astype(compute_dtype)
    w2 = params["w2"].astype(compute_dtype)
    w3 = params["w3"].astype(compute_dtype)
    b1 = params["b1"].reshape(H0, 1).astype(jnp.float32)
    b2 = params["b2"].reshape(H1, 1).astype(jnp.float32)
    b3 = params["b3"].reshape(A, 1).astype(jnp.float32)

    Bp, TB = _choose_tiling(B, batch_tile, S, H0, H1, A)

    # Transpose once so the batch is lane-dense inside the kernel; pad lanes
    # only up to the chosen (128-aligned) tile grid.
    xT = x.T.astype(compute_dtype)                    # (S, B)
    if Bp != B:
        xT = jnp.pad(xT, ((0, 0), (0, Bp - B)))

    grid = (Bp // TB,)

    in_specs = [
        pl.BlockSpec((S, TB), lambda i: (0, i)),      # x tile: batch in lanes
        pl.BlockSpec((H0, S), lambda i: (0, 0)),      # weights/biases: constant
        pl.BlockSpec((H0, 1), lambda i: (0, 0)),      #   block index -> DMA'd
        pl.BlockSpec((H1, H0), lambda i: (0, 0)),     #   once, VMEM-resident
        pl.BlockSpec((H1, 1), lambda i: (0, 0)),
        pl.BlockSpec((A, H1), lambda i: (0, 0)),
        pl.BlockSpec((A, 1), lambda i: (0, 0)),
    ]
    out_spec = pl.BlockSpec((A, TB), lambda i: (0, i))

    # v7x: pass core_parallel=True to shard the batch axis over both
    # TensorCores (plain "parallel" does not change codegen per review).
    semantics = (pltpu.CORE_PARALLEL,) if core_parallel else ("parallel",)

    outT = pl.pallas_call(
        qnetwork_kernel,
        out_shape=jax.ShapeDtypeStruct((A, Bp), jnp.float32),
        grid=grid,
        in_specs=in_specs,
        out_specs=out_spec,
        compiler_params=pltpu.CompilerParams(dimension_semantics=semantics),
    )(xT, w1, b1, w2, b2, w3, b3)

    q = outT.T                                        # (Bp, A)
    return q[:B] if Bp != B else q


def init_params(key, state_size, action_size, hidden_sizes=(64, 64)):
    """PyTorch nn.Linear default init (uniform +-1/sqrt(fan_in)).
    Weights stored in PyTorch-native (out_features, in_features) layout."""
    h0, h1 = hidden_sizes

    def linear(key, fan_in, fan_out):
        kw, kb = jax.random.split(key)
        bound = 1.0 / jnp.sqrt(fan_in)
        w = jax.random.uniform(kw, (fan_out, fan_in), jnp.float32, -bound, bound)
        b = jax.random.uniform(kb, (fan_out,), jnp.float32, -bound, bound)
        return w, b

    k1, k2, k3 = jax.random.split(key, 3)
    w1, b1 = linear(k1, state_size, h0)
    w2, b2 = linear(k2, h0, h1)
    w3, b3 = linear(k3, h1, action_size)
    return dict(w1=w1, b1=b1, w2=w2, b2=b2, w3=w3, b3=b3)


if __name__ == "__main__":
    state_size = 16
    action_size = 8
    hidden_sizes = (64, 64)

    key = jax.random.PRNGKey(0)
    kx, kx2, kp = jax.random.split(key, 3)
    params = init_params(kp, state_size, action_size, hidden_sizes)

    # 1) Tiny batch, forcing the Pallas path (single-step grid, lane dim == B).
    x_small = jax.random.normal(kx, (8, state_size), jnp.float32)
    out_small = jax.block_until_ready(
        qnetwork_forward(x_small, params, min_pallas_batch=0))
    ref_small = reference_forward(x_small, params)
    assert out_small.shape == (8, action_size)
    assert jnp.allclose(out_small, ref_small, atol=1e-5, rtol=1e-5), "mismatch"

    # 2) Ragged batch exercising the multi-step grid + lane-padding path.
    x_big = jax.random.normal(kx2, (300, state_size), jnp.float32)
    out_big = jax.block_until_ready(
        qnetwork_forward(x_big, params, batch_tile=128, min_pallas_batch=0))
    ref_big = reference_forward(x_big, params)
    assert out_big.shape == (300, action_size)
    assert jnp.allclose(out_big, ref_big, atol=1e-5, rtol=1e-5), "mismatch (tiled)"

    # 3) Default small-batch fast path (plain JAX, no pallas_call).
    out_fast = jax.block_until_ready(qnetwork_forward(x_small, params))
    assert jnp.allclose(out_fast, ref_small, atol=1e-5, rtol=1e-5), "mismatch (fast)"

    print("KERNEL_OK")
</pallas_src>

<mosaic_0001>
module attributes {stable_mosaic.version = 11 : i64} {
  func.func @qnetwork_kernel(%arg0: i32, %arg1: memref<16x8xf32, #tpu.memory_space<vmem>>, %arg2: memref<64x16xf32, #tpu.memory_space<vmem>>, %arg3: memref<64x1xf32, #tpu.memory_space<vmem>>, %arg4: memref<64x64xf32, #tpu.memory_space<vmem>>, %arg5: memref<64x1xf32, #tpu.memory_space<vmem>>, %arg6: memref<8x64xf32, #tpu.memory_space<vmem>>, %arg7: memref<8x1xf32, #tpu.memory_space<vmem>>, %arg8: memref<8x8xf32, #tpu.memory_space<vmem>>) attributes {dimension_semantics = [#tpu.dimension_semantics<parallel>], iteration_bounds = array<i64: 1>, scalar_prefetch = 0 : i64, scratch_operands = 0 : i64, tpu.core_type = #tpu.core_type<tc>, window_params = [{transform_indices = @transform_0, window_bounds = array<i64: 16, 8>}, {pipeline_mode = #tpu.pipeline_mode<synchronous>, transform_indices = @transform_1, window_bounds = array<i64: 64, 16>}, {pipeline_mode = #tpu.pipeline_mode<synchronous>, transform_indices = @transform_2, window_bounds = array<i64: 64, 1>}, {pipeline_mode = #tpu.pipeline_mode<synchronous>, transform_indices = @transform_3, window_bounds = array<i64: 64, 64>}, {pipeline_mode = #tpu.pipeline_mode<synchronous>, transform_indices = @transform_4, window_bounds = array<i64: 64, 1>}, {pipeline_mode = #tpu.pipeline_mode<synchronous>, transform_indices = @transform_5, window_bounds = array<i64: 8, 64>}, {pipeline_mode = #tpu.pipeline_mode<synchronous>, transform_indices = @transform_6, window_bounds = array<i64: 8, 1>}, {transform_indices = @transform_7, window_bounds = array<i64: 8, 8>}]} {
    %c0 = arith.constant 0 : index
    %c0_0 = arith.constant 0 : index
    %0 = vector.load %arg1[%c0, %c0_0] : memref<16x8xf32, #tpu.memory_space<vmem>>, vector<16x8xf32>
    %c0_1 = arith.constant 0 : index
    %c0_2 = arith.constant 0 : index
    %1 = vector.load %arg2[%c0_1, %c0_2] : memref<64x16xf32, #tpu.memory_space<vmem>>, vector<64x16xf32>
    %cst = arith.constant dense<0.000000e+00> : vector<64x8xf32>
    %2 = tpu.matmul %1, %0, %cst {dimension_numbers = #tpu.dot_dimension_numbers<[1], [0], [0], [1], [0, 0, 1, 1], [], []>} : vector<64x16xf32>, vector<16x8xf32>, vector<64x8xf32> -> vector<64x8xf32>
    %c0_3 = arith.constant 0 : index
    %c0_4 = arith.constant 0 : index
    %3 = vector.load %arg3[%c0_3, %c0_4] : memref<64x1xf32, #tpu.memory_space<vmem>>, vector<64x1xf32>
    %4 = vector.broadcast %3 : vector<64x1xf32> to vector<64x8xf32>
    %5 = arith.addf %2, %4 : vector<64x8xf32>
    %cst_5 = arith.constant 0.000000e+00 : f32
    %6 = vector.broadcast %cst_5 : f32 to vector<64x8xf32>
    %7 = arith.maximumf %5, %6 : vector<64x8xf32>
    %c0_6 = arith.constant 0 : index
    %c0_7 = arith.constant 0 : index
    %8 = vector.load %arg4[%c0_6, %c0_7] : memref<64x64xf32, #tpu.memory_space<vmem>>, vector<64x64xf32>
    %cst_8 = arith.constant dense<0.000000e+00> : vector<64x8xf32>
    %9 = tpu.matmul %8, %7, %cst_8 {dimension_numbers = #tpu.dot_dimension_numbers<[1], [0], [0], [1], [0, 0, 1, 1], [], []>} : vector<64x64xf32>, vector<64x8xf32>, vector<64x8xf32> -> vector<64x8xf32>
    %c0_9 = arith.constant 0 : index
    %c0_10 = arith.constant 0 : index
    %10 = vector.load %arg5[%c0_9, %c0_10] : memref<64x1xf32, #tpu.memory_space<vmem>>, vector<64x1xf32>
    %11 = vector.broadcast %10 : vector<64x1xf32> to vector<64x8xf32>
    %12 = arith.addf %9, %11 : vector<64x8xf32>
    %cst_11 = arith.constant 0.000000e+00 : f32
    %13 = vector.broadcast %cst_11 : f32 to vector<64x8xf32>
    %14 = arith.maximumf %12, %13 : vector<64x8xf32>
    %c0_12 = arith.constant 0 : index
    %c0_13 = arith.constant 0 : index
    %15 = vector.load %arg6[%c0_12, %c0_13] : memref<8x64xf32, #tpu.memory_space<vmem>>, vector<8x64xf32>
    %cst_14 = arith.constant dense<0.000000e+00> : vector<8x8xf32>
    %16 = tpu.matmul %15, %14, %cst_14 {dimension_numbers = #tpu.dot_dimension_numbers<[1], [0], [0], [1], [0, 0, 1, 1], [], []>} : vector<8x64xf32>, vector<64x8xf32>, vector<8x8xf32> -> vector<8x8xf32>
    %c0_15 = arith.constant 0 : index
    %c0_16 = arith.constant 0 : index
    %17 = vector.load %arg7[%c0_15, %c0_16] : memref<8x1xf32, #tpu.memory_space<vmem>>, vector<8x1xf32>
    %18 = vector.broadcast %17 : vector<8x1xf32> to vector<8x8xf32>
    %19 = arith.addf %16, %18 : vector<8x8xf32>
    %c0_17 = arith.constant 0 : index
    %c0_18 = arith.constant 0 : index
    %20 = vector.load %arg8[%c0_17, %c0_18] : memref<8x8xf32, #tpu.memory_space<vmem>>, vector<8x8xf32>
    tpu.vector_store %arg8[%c0_17, %c0_18], %19 {strides = array<i32>} : memref<8x8xf32, #tpu.memory_space<vmem>>, vector<8x8xf32>,
    return
  }
  func.func @transform_0(%arg0: i32) -> (i32, i32) {
    %c0_i32 = arith.constant 0 : i32
    %c0_i32_0 = arith.constant 0 : i32
    return %c0_i32, %arg0 : i32, i32
  }
  func.func @transform_1(%arg0: i32) -> (i32, i32) {
    %c0_i32 = arith.constant 0 : i32
    %c0_i32_0 = arith.constant 0 : i32
    %c0_i32_1 = arith.constant 0 : i32
    return %c0_i32, %c0_i32_0 : i32, i32
  }
  func.func @transform_2(%arg0: i32) -> (i32, i32) {
    %c0_i32 = arith.constant 0 : i32
    %c0_i32_0 = arith.constant 0 : i32
    %c0_i32_1 = arith.constant 0 : i32
    return %c0_i32, %c0_i32_0 : i32, i32
  }
  func.func @transform_3(%arg0: i32) -> (i32, i32) {
    %c0_i32 = arith.constant 0 : i32
    %c0_i32_0 = arith.constant 0 : i32
    %c0_i32_1 = arith.constant 0 : i32
    return %c0_i32, %c0_i32_0 : i32, i32
  }
  func.func @transform_4(%arg0: i32) -> (i32, i32) {
    %c0_i32 = arith.constant 0 : i32
    %c0_i32_0 = arith.constant 0 : i32
    %c0_i32_1 = arith.constant 0 : i32
    return %c0_i32, %c0_i32_0 : i32, i32
  }
  func.func @transform_5(%arg0: i32) -> (i32, i32) {
    %c0_i32 = arith.constant 0 : i32
    %c0_i32_0 = arith.constant 0 : i32
    %c0_i32_1 = arith.constant 0 : i32
    return %c0_i32, %c0_i32_0 : i32, i32
  }
  func.func @transform_6(%arg0: i32) -> (i32, i32) {
    %c0_i32 = arith.constant 0 : i32
    %c0_i32_0 = arith.constant 0 : i32
    %c0_i32_1 = arith.constant 0 : i32
    return %c0_i32, %c0_i32_0 : i32, i32
  }
  func.func @transform_7(%arg0: i32) -> (i32, i32) {
    %c0_i32 = arith.constant 0 : i32
    %c0_i32_0 = arith.constant 0 : i32
    return %c0_i32, %arg0 : i32, i32
  }
}

</mosaic_0001>

<bundles_post_ra>
// kernel: qnetwork_forward.1
= control target key start
LH: loop header
LB: loop body
LE: loop exit
PB: predicated region body
PF: predicated region fallthrough
CT: control target
= control target key end

     0   :  { %v355_v0 = vmov 0   ;;  %vm84_vm0 = vcmask 130048   ;;  %vm214_vm1 = vcmask 523264   ;;  %vm318_vm2 = vcmask 64512   ;;  %s524_s2 = inlined_call_operand.vmem [shape: f32[64,1], index: 2, kind: input, shape index: {}]   ;;  %s525_s0 = inlined_call_operand.vmem [shape: f32[16,8], index: 0, kind: input, shape index: {}]   ;;  %s526_s1 = inlined_call_operand.vmem [shape: f32[64,16], index: 1, kind: input, shape index: {}]   ;;  %s527_s4 = inlined_call_operand.vmem [shape: f32[64,1], index: 4, kind: input, shape index: {}]   ;;  %s528_s6 = inlined_call_operand.vmem [shape: f32[8,1], index: 6, kind: input, shape index: {}]   ;;  %s529_s3 = inlined_call_operand.vmem [shape: f32[64,64], index: 3, kind: input, shape index: {}]   ;;  %s530_s5 = inlined_call_operand.vmem [shape: f32[8,64], index: 5, kind: input, shape index: {}]   ;;  %s531_s7 = inlined_call_operand.vmem [shape: f32[8,8], index: 7, kind: output, shape index: {}]  }
   0x1   :  { %353 = vset.pattern.permute.xlu1 %v355_v0  ;;  %352 = vset.pattern.permute.xlu0 %v355_v0  ;;  %v43_v1 = vld [vmem:[%s524_s2 + $0x38] sm:$0xff]  ;;  %v41_v2 = vld [vmem:[%s524_s2 + $0x28] sm:$0xff]  ;;  %v26_v4 = vld [vmem:[%s525_s0] sm:$0xff] }
   0x2   :  { %v27_v3 = vld [vmem:[%s525_s0 + $0x8] sm:$0xff]  ;;  %81 = vperm.xlu0 %352, %v43_v1   ;;  %71 = vperm.xlu1 %353, %v41_v2   ;;  %v28_v5 = vld [vmem:[%s526_s1] sm:$0xff]  ;;  %v42_v7 = vld [vmem:[%s524_s2 + $0x30] sm:$0xff] }
   0x3   :  { %123 = vmatpush.msra.mxu0 %v27_v3  ;;  %341 = vmatpush.msra.mxu2 %v27_v3  ;;  %v33_v6 = vld [vmem:[%s526_s1 + $0x28] sm:$0xff]  ;;  %v40_v8 = vld [vmem:[%s524_s2 + $0x20] sm:$0xff]  ;;  %v39_v9 = vld [vmem:[%s524_s2 + $0x18] sm:$0xff] }
   0x4   :  { %354 = vset.pattern.permute.xlu2 %v355_v0  ;;  %v29_v10 = vld [vmem:[%s526_s1 + $0x8] sm:$0xff]  ;;  %v34_v11 = vld [vmem:[%s526_s1 + $0x30] sm:$0xff]  ;;  %v36_v14 = vld [vmem:[%s524_s2] sm:$0xff] }
   0x5   :  { %124 = vmatpush.msra.mxu0 %v26_v4  ;;  %342 = vmatpush.msra.mxu2 %v26_v4  ;;  %v38_v12 = vld [vmem:[%s524_s2 + $0x10] sm:$0xff]  ;;  %v37_v13 = vld [vmem:[%s524_s2 + $0x8] sm:$0xff]  ;;  %v35_v16 = vld [vmem:[%s526_s1 + $0x38] sm:$0xff] }
   0x6   :  { %324 = vmatmul.msk.f32.vlgmr.msra.gmra.mxu0 %vm84_vm0, %v28_v5  ;;  %329 = vmatmul.msk.f32.vlgmr.msra.gmra.mxu2 %vm84_vm0, %v33_v6  ;;  %v30_v15 = vld [vmem:[%s526_s1 + $0x10] sm:$0xff]  ;;  %v173_v17 = vld [vmem:[%s527_s4 + $0x38] sm:$0xff]  ;;  %v171_v19 = vld [vmem:[%s527_s4 + $0x28] sm:$0xff] }
   0x7   :  { %61 = vperm.xlu2 %354, %v39_v9   ;;  %v172_v18 = vld [vmem:[%s527_s4 + $0x30] sm:$0xff]  ;;  %v31_v20 = vld [vmem:[%s526_s1 + $0x18] sm:$0xff]  ;;  %v170_v21 = vld [vmem:[%s527_s4 + $0x20] sm:$0xff] }
   0x8   :  { %v169_v22 = vld [vmem:[%s527_s4 + $0x18] sm:$0xff]  ;;  %v168_v23 = vld [vmem:[%s527_s4 + $0x10] sm:$0xff]  ;;  %v32_v24 = vld [vmem:[%s526_s1 + $0x20] sm:$0xff] }
   0x9   :  { %v167_v25 = vld [vmem:[%s527_s4 + $0x8] sm:$0xff]  ;;  %v166_v26 = vld [vmem:[%s527_s4] sm:$0xff]  ;;  %v160_v0 = vld [vmem:[%s529_s3 + $0x10] sm:$0xff] }
   0xa   :  { %76 = vperm.xlu0 %352, %v42_v7   ;;  %66 = vperm.xlu1 %353, %v40_v8   ;;  %v289_v27 = vld [vmem:[%s528_s6] sm:$0xff]  ;;  %v159_v62 = vld [vmem:[%s529_s3 + $0x8] sm:$0xff]  ;;  %v164_v1 = vld [vmem:[%s529_s3 + $0x30] sm:$0xff] }
   0xb   :  { %v158_v60 = vld [vmem:[%s529_s3] sm:$0xff]  ;;  %v163_v63 = vld [vmem:[%s529_s3 + $0x28] sm:$0xff]  ;;  %v161_v2 = vld [vmem:[%s529_s3 + $0x18] sm:$0xff] }
   0xc   :  { %v162_v61 = vld [vmem:[%s529_s3 + $0x20] sm:$0xff]  ;;  %v165_v3 = vld [vmem:[%s529_s3 + $0x38] sm:$0xff] }
   0xe   :  { %325 = vmatmul.msk.f32.gmra.mxu0 %vm84_vm0, %v29_v10  ;;  %330 = vmatmul.msk.f32.gmra.mxu2 %vm84_vm0, %v34_v11 }
   0xf   :  { %56 = vperm.xlu2 %354, %v38_v12  }
  0x12   :  { %51 = vperm.xlu0 %352, %v37_v13   ;;  %46 = vperm.xlu1 %353, %v36_v14  }
  0x16   :  { %326 = vmatmul.msk.f32.gmra.mxu0 %vm84_vm0, %v30_v15  ;;  %331 = vmatmul.msk.f32.gmra.mxu2 %vm84_vm0, %v35_v16 }
  0x17   :  { %211 = vperm.xlu2 %354, %v173_v17  }
  0x1a   :  { %206 = vperm.xlu0 %352, %v172_v18   ;;  %201 = vperm.xlu1 %353, %v171_v19  }
  0x1e   :  { %327 = vmatmul.msk.f32.gmra.mxu0 %vm84_vm0, %v31_v20 }
  0x1f   :  { %196 = vperm.xlu2 %354, %v170_v21  }
  0x22   :  { %191 = vperm.xlu0 %352, %v169_v22   ;;  %186 = vperm.xlu1 %353, %v168_v23  }
  0x26   :  { %328 = vmatmul.msk.f32.gmra.mxu0 %vm84_vm0, %v32_v24 }
  0x27   :  { %181 = vperm.xlu2 %354, %v167_v25  }
  0x2a   :  { %176 = vperm.xlu0 %352, %v166_v26   ;;  %292 = vperm.xlu1 %353, %v289_v27  }
  0x61   :  { %v62_v39 = vpop.permute.xlu2 %61 }
  0x69   :  { %v57_v49 = vpop.permute.xlu2 %56 }
  0x71   :  { %v212_v8 = vpop.permute.xlu2 %211 }
  0x74   :  { %v82_v31 = vpop.permute.xlu0 %81  ;;  %v72_v33 = vpop.permute.xlu1 %71 }
  0x79   :  { %v197_v13 = vpop.permute.xlu2 %196 }
  0x7c   :  { %v77_v35 = vpop.permute.xlu0 %76  ;;  %v67_v43 = vpop.permute.xlu1 %66 }
  0x83   :  { %v126_v28 = vpop.f32.mrf.mxu0 }
  0x84   :  { %v52_v52 = vpop.permute.xlu0 %51  ;;  %v47_v53 = vpop.permute.xlu1 %46 }
  0x85   :  { %v127_v56 = vadd.f32 %v126_v28, %v47_v53  ;;  %v182_v28 = vpop.permute.xlu2 %181 }
  0x87   :  { %v150_v59 = vmax.f32 %v127_v56, 0.0 }
  0x89   :  { %v141_v29 = vpop.f32.mrf.mxu2 }
  0x8a   :  { %v142_v41 = vadd.f32 %v141_v29, %v72_v33 }
  0x8b   :  { %v129_v30 = vpop.f32.mrf.mxu0 }
  0x8c   :  { %v155_v45 = vmax.f32 %v142_v41, 0.0  ;;  %v130_v54 = vadd.f32 %v129_v30, %v52_v52  ;;  %v207_v9 = vpop.permute.xlu0 %206  ;;  %v202_v12 = vpop.permute.xlu1 %201 }
  0x8e   :  { %v151_v58 = vmax.f32 %v130_v54, 0.0 }
  0x91   :  { %v144_v32 = vpop.f32.mrf.mxu2 }
  0x92   :  { %v145_v37 = vadd.f32 %v144_v32, %v77_v35 }
  0x93   :  { %v132_v34 = vpop.f32.mrf.mxu0 }
  0x94   :  { %v156_v44 = vmax.f32 %v145_v37, 0.0  ;;  %v133_v50 = vadd.f32 %v132_v34, %v57_v49  ;;  %v192_v17 = vpop.permute.xlu0 %191  ;;  %v187_v25 = vpop.permute.xlu1 %186 }
  0x96   :  { %v152_v57 = vmax.f32 %v133_v50, 0.0 }
  0x99   :  { %v147_v36 = vpop.f32.mrf.mxu2 }
  0x9a   :  { %v148_v38 = vadd.f32 %v147_v36, %v82_v31  ;;  %v288_v36 = vld [vmem:[%s530_s5] sm:$0xff] }
  0x9b   :  { %v135_v40 = vpop.f32.mrf.mxu0 }
  0x9c   :  { %v157_v42 = vmax.f32 %v148_v38, 0.0  ;;  %v136_v47 = vadd.f32 %v135_v40, %v62_v39  ;;  %v177_v31 = vpop.permute.xlu0 %176  ;;  %v293_v37 = vpop.permute.xlu1 %292 }
  0x9e   :  { %247 = vmatpush.msra.mxu1 %v157_v42  ;;  %343 = vmatpush.msra.mxu3 %v157_v42  ;;  %v153_v55 = vmax.f32 %v136_v47, 0.0 }
  0xa0   :  { %248 = vmatpush.msra.mxu1 %v156_v44  ;;  %344 = vmatpush.msra.mxu3 %v156_v44 }
  0xa2   :  { %249 = vmatpush.msra.mxu1 %v155_v45  ;;  %345 = vmatpush.msra.mxu3 %v155_v45 }
  0xa3   :  { %v138_v46 = vpop.f32.mrf.mxu0 }
  0xa4   :  { %v139_v48 = vadd.f32 %v138_v46, %v67_v43 }
  0xa6   :  { %v154_v51 = vmax.f32 %v139_v48, 0.0 }
  0xa8   :  { %250 = vmatpush.msra.mxu1 %v154_v51  ;;  %346 = vmatpush.msra.mxu3 %v154_v51 }
  0xaa   :  { %251 = vmatpush.msra.mxu1 %v153_v55  ;;  %347 = vmatpush.msra.mxu3 %v153_v55 }
  0xac   :  { %252 = vmatpush.msra.mxu1 %v152_v57  ;;  %348 = vmatpush.msra.mxu3 %v152_v57 }
  0xae   :  { %253 = vmatpush.msra.mxu1 %v151_v58  ;;  %349 = vmatpush.msra.mxu3 %v151_v58 }
  0xb0   :  { %254 = vmatpush.msra.mxu1 %v150_v59  ;;  %350 = vmatpush.msra.mxu3 %v150_v59 }
  0xb1   :  { %332 = vmatmul.msk.f32.vlgmr.msra.gmra.mxu1 %vm214_vm1, %v158_v60  ;;  %336 = vmatmul.msk.f32.vlgmr.msra.gmra.mxu3 %vm214_vm1, %v162_v61 }
  0xb9   :  { %333 = vmatmul.msk.f32.gmra.mxu1 %vm214_vm1, %v159_v62  ;;  %337 = vmatmul.msk.f32.gmra.mxu3 %vm214_vm1, %v163_v63 }
  0xc1   :  { %334 = vmatmul.msk.f32.gmra.mxu1 %vm214_vm1, %v160_v0  ;;  %338 = vmatmul.msk.f32.gmra.mxu3 %vm214_vm1, %v164_v1 }
  0xc9   :  { %335 = vmatmul.msk.f32.gmra.mxu1 %vm214_vm1, %v161_v2  ;;  %339 = vmatmul.msk.f32.gmra.mxu3 %vm214_vm1, %v165_v3 }
 0x12e   :  { %v256_v4 = vpop.f32.mrf.mxu1 }
 0x12f   :  { %v257_v32 = vadd.f32 %v256_v4, %v177_v31 }
 0x131   :  { %v280_v35 = vmax.f32 %v257_v32, 0.0 }
 0x134   :  { %v268_v5 = vpop.f32.mrf.mxu3 }
 0x135   :  { %v269_v21 = vadd.f32 %v268_v5, %v197_v13 }
 0x136   :  { %v259_v6 = vpop.f32.mrf.mxu1 }
 0x137   :  { %v284_v26 = vmax.f32 %v269_v21, 0.0  ;;  %v260_v29 = vadd.f32 %v259_v6, %v182_v28 }
 0x139   :  { %v281_v34 = vmax.f32 %v260_v29, 0.0 }
 0x13c   :  { %v271_v7 = vpop.f32.mrf.mxu3 }
 0x13d   :  { %v272_v18 = vadd.f32 %v271_v7, %v202_v12 }
 0x13e   :  { %v262_v11 = vpop.f32.mrf.mxu1 }
 0x13f   :  { %v285_v23 = vmax.f32 %v272_v18, 0.0  ;;  %v263_v27 = vadd.f32 %v262_v11, %v187_v25 }
 0x141   :  { %v282_v33 = vmax.f32 %v263_v27, 0.0 }
 0x144   :  { %v274_v10 = vpop.f32.mrf.mxu3 }
 0x145   :  { %v275_v15 = vadd.f32 %v274_v10, %v207_v9 }
 0x146   :  { %v265_v20 = vpop.f32.mrf.mxu1 }
 0x147   :  { %v286_v22 = vmax.f32 %v275_v15, 0.0  ;;  %v266_v24 = vadd.f32 %v265_v20, %v192_v17 }
 0x149   :  { %v283_v30 = vmax.f32 %v266_v24, 0.0 }
 0x14c   :  { %v277_v14 = vpop.f32.mrf.mxu3 }
 0x14d   :  { %v278_v16 = vadd.f32 %v277_v14, %v212_v8 }
 0x14f   :  { %v287_v19 = vmax.f32 %v278_v16, 0.0 }
 0x151   :  { %306 = vmatpush.msrb.mxu2 %v287_v19 }
 0x153   :  { %307 = vmatpush.msrb.mxu2 %v286_v22 }
 0x155   :  { %308 = vmatpush.msrb.mxu2 %v285_v23 }
 0x157   :  { %309 = vmatpush.msrb.mxu2 %v284_v26 }
 0x159   :  { %310 = vmatpush.msrb.mxu2 %v283_v30 }
 0x15b   :  { %311 = vmatpush.msrb.mxu2 %v282_v33 }
 0x15d   :  { %312 = vmatpush.msrb.mxu2 %v281_v34 }
 0x15f   :  { %313 = vmatpush.msrb.mxu2 %v280_v35 }
 0x160   :  { %340 = vmatmul.msk.f32.vlgmr.msrb.gmra.mxu2 %vm214_vm1, %v288_v36 }
 0x1e3   :  { %v315_v38 = vpop.f32.mrf.mxu2 }
 0x1e4   :  { %v316_v39 = vadd.f32 %v315_v38, %v293_v37 }
 0x1e6   :  { %319 = vst.msk [vmem:[%s531_s7] sm:$0xff] %vm318_vm2, %v316_v39 }

</bundles_post_ra>
